<compile_context>
chip_gen: v7x
topology: tpu7x:2x2x1
jax: 0.10.0
libtpu: 0.0.40
codegen_flags: <defaults>
</compile_context>

<pallas_src>
import functools

import jax
import jax.numpy as jnp
from jax.experimental import pallas as pl
from jax.experimental.pallas import tpu as pltpu


def _round_up(x, m):
    return (x + m - 1) // m * m


def _newclip_kernel(x_ref, w1t_ref, w2t_ref, o_ref, *, ratio, one_minus_ratio):
    x = x_ref[...]                                   # [tb, C] (native dtype)
    xb = x.astype(w1t_ref.dtype)                     # bf16 for the MXU
    h = jnp.dot(xb, w1t_ref[...], preferred_element_type=jnp.float32)
    h = jnp.maximum(h, 0.0)
    y = jnp.dot(h.astype(w2t_ref.dtype), w2t_ref[...],
                preferred_element_type=jnp.float32)
    y = jnp.maximum(y, 0.0)
    # Residual blend in f32 with hoisted scalar constants.
    out = ratio * y + one_minus_ratio * x.astype(jnp.float32)
    o_ref[...] = out.astype(o_ref.dtype)


def prepare_adapter_weights(w1, w2, *, compute_dtype=jnp.bfloat16):
    """w1: [hidden, C], w2: [C, hidden] (PyTorch nn.Linear [out, in] layout).

    Returns (w1t, w2t): transposed to [in, out], with only the (small) hidden
    dim zero-padded to a multiple of 128, cast to the MXU compute dtype.
    Padding is exact: relu(0)=0 and zero hidden columns contribute nothing.
    Call ONCE at model load — not in the per-step hot path.
    """
    hidden, C = w1.shape
    assert w2.shape == (C, hidden)
    Hp = _round_up(hidden, 128)
    w1t = jnp.zeros((C, Hp), compute_dtype).at[:, :hidden].set(
        w1.T.astype(compute_dtype))
    w2t = jnp.zeros((Hp, C), compute_dtype).at[:hidden, :].set(
        w2.T.astype(compute_dtype))
    return w1t, w2t


def _vmem_capacity_bytes():
    try:
        return int(pltpu.get_tpu_info().vmem_capacity_bytes)
    except Exception:
        return 64 << 20   # conservative fallback (v7x per-TC VMEM)


def newclip_forward(image_features, w1t, w2t, *, ratio=0.2, block_b=None,
                    vmem_limit_bytes=None):
    """image_features: [B, C] (f32 or bf16); (w1t, w2t) from prepare_adapter_weights.

    Output dtype matches the input dtype (bf16 in -> bf16 out halves both HBM
    streams; accumulation is always f32).  Numerics vs an f32 reference are at
    bf16-matmul tolerance (~2e-2).
    """
    B, C = image_features.shape
    Cw, Hp = w1t.shape
    assert Cw == C and w2t.shape == (Hp, C) and Hp % 128 == 0

    xbytes = image_features.dtype.itemsize
    obytes = xbytes
    wbytes = w1t.dtype.itemsize

    # Sublane alignment for batch tiles smaller than B.
    row_align = 16 if xbytes < 4 else 8

    vmem_cap = _vmem_capacity_bytes()
    weight_bytes = 2 * C * Hp * wbytes

    # Per-row VMEM: double-buffered x/out tiles + in-kernel intermediates
    # (xb bf16, x f32 copy, y f32, out f32 along C; h f32 + h bf16 along Hp).
    per_row = (2 * C * xbytes
               + 2 * C * obytes
               + C * (2 + 4 + 4 + 4)
               + Hp * (4 + 2))

    if block_b is None:
        # Use about half the chip's VMEM for activations; big tiles amortize
        # the ~0.35 us per-grid-step overhead (256 -> 1024/2048 is ~1.3-1.4x).
        budget = max(vmem_cap // 2 - weight_bytes, 1 << 20)
        block_b = max(min(budget // per_row, 2048), row_align)

    # Ensure >= 2 grid steps when B allows so v7x megacore uses both TCs
    # (and DMA/compute overlap exists); harmless elsewhere.
    if B > row_align:
        block_b = min(block_b, _round_up(pl.cdiv(B, 2), row_align))

    if block_b >= B:
        block_b = B                       # full-extent block: no align needed
    else:
        block_b = max((block_b // row_align) * row_align, row_align)

    grid = (pl.cdiv(B, block_b),)

    # Explicit VMEM budget capped at physical capacity minus headroom.
    need = block_b * per_row + weight_bytes
    if vmem_limit_bytes is None:
        cap = max(vmem_cap - (8 << 20), 16 << 20)
        vmem_limit_bytes = min(max(int(need * 1.25) + (4 << 20), 32 << 20), cap)

    kernel = functools.partial(_newclip_kernel,
                               ratio=float(ratio),
                               one_minus_ratio=float(1.0 - ratio))

    cost = pl.CostEstimate(
        flops=4 * B * C * Hp,                      # two matmuls
        transcendentals=0,
        bytes_accessed=B * C * (xbytes + obytes) + weight_bytes)

    out = pl.pallas_call(
        kernel,
        out_shape=jax.ShapeDtypeStruct((B, C), image_features.dtype),
        grid_spec=pltpu.PrefetchScalarGridSpec(
            num_scalar_prefetch=0,
            grid=grid,
            in_specs=[
                pl.BlockSpec((block_b, C), lambda i: (i, 0)),          # x tile
                pl.BlockSpec((C, Hp), lambda i: (0, 0),                # W1^T
                             pipeline_mode=pl.Buffered(1)),
                pl.BlockSpec((Hp, C), lambda i: (0, 0),                # W2^T
                             pipeline_mode=pl.Buffered(1)),
            ],
            out_specs=pl.BlockSpec((block_b, C), lambda i: (i, 0)),
        ),
        compiler_params=pltpu.CompilerParams(
            dimension_semantics=("parallel",),
            vmem_limit_bytes=vmem_limit_bytes),
        cost_estimate=cost,
    )(image_features, w1t, w2t)

    return out


def newclip_reference(image_features, w1, w2, ratio=0.2):
    x = jnp.maximum(image_features @ w1.T, 0.0)
    x = jnp.maximum(x @ w2.T, 0.0)
    return ratio * x + (1.0 - ratio) * image_features


if __name__ == "__main__":
    key = jax.random.PRNGKey(0)
    ratio = 0.2

    # Small shapes consistent with the module: batch=8, c_in=32, reduction=4.
    B, C, reduction = 8, 32, 4
    hidden = C // reduction

    k1, k2, k3, k4 = jax.random.split(key, 4)
    image_features = jax.random.normal(k1, (B, C), dtype=jnp.float32)
    # PyTorch nn.Linear layout: [out_features, in_features].
    w1 = jax.random.normal(k2, (hidden, C), dtype=jnp.float32) * 0.1
    w2 = jax.random.normal(k3, (C, hidden), dtype=jnp.float32) * 0.1

    # Weight prep (transpose / hidden-pad / bf16 cast) happens once, off the hot path.
    w1t, w2t = prepare_adapter_weights(w1, w2)

    out = newclip_forward(image_features, w1t, w2t, ratio=ratio)
    out = jax.block_until_ready(out)
    ref = newclip_reference(image_features, w1, w2, ratio=ratio)
    assert out.shape == (B, C)
    # bf16 matmuls (f32 accumulation) -> relaxed tolerance vs f32 reference.
    assert jnp.allclose(out, ref, atol=2e-2, rtol=2e-2), "mismatch vs reference"

    # Second config: B not a multiple of block_b -> partial trailing tile, grid > 1.
    B2 = 20
    x2 = jax.random.normal(k4, (B2, C), dtype=jnp.float32)
    out2 = newclip_forward(x2, w1t, w2t, ratio=ratio, block_b=8)
    out2 = jax.block_until_ready(out2)
    ref2 = newclip_reference(x2, w1, w2, ratio=ratio)
    assert out2.shape == (B2, C)
    assert jnp.allclose(out2, ref2, atol=2e-2, rtol=2e-2), "mismatch (partial tile)"

    # Third config: bf16 activations end-to-end (halves the x/out HBM streams).
    x3 = image_features.astype(jnp.bfloat16)
    out3 = newclip_forward(x3, w1t, w2t, ratio=ratio)
    out3 = jax.block_until_ready(out3)
    assert out3.shape == (B, C) and out3.dtype == jnp.bfloat16
    assert jnp.allclose(out3.astype(jnp.float32), ref, atol=6e-2, rtol=6e-2), \
        "mismatch (bf16 activations)"

    print("KERNEL_OK")
</pallas_src>

<mosaic_0001>
module attributes {stable_mosaic.version = 11 : i64} {
  func.func @_newclip_kernel(%arg0: i32, %arg1: memref<8x32xf32, #tpu.memory_space<vmem>>, %arg2: memref<32x128xbf16, #tpu.memory_space<vmem>>, %arg3: memref<128x32xbf16, #tpu.memory_space<vmem>>, %arg4: memref<8x32xf32, #tpu.memory_space<vmem>>) attributes {dimension_semantics = [#tpu.dimension_semantics<parallel>], iteration_bounds = array<i64: 1>, scalar_prefetch = 0 : i64, scratch_operands = 0 : i64, tpu.core_type = #tpu.core_type<tc>, window_params = [{transform_indices = @transform_0, window_bounds = array<i64: 8, 32>}, {pipeline_mode = #tpu.pipeline_mode<synchronous>, transform_indices = @transform_1, window_bounds = array<i64: 32, 128>}, {pipeline_mode = #tpu.pipeline_mode<synchronous>, transform_indices = @transform_2, window_bounds = array<i64: 128, 32>}, {transform_indices = @transform_3, window_bounds = array<i64: 8, 32>}]} {
    %c0 = arith.constant 0 : index
    %c0_0 = arith.constant 0 : index
    %0 = vector.load %arg1[%c0, %c0_0] : memref<8x32xf32, #tpu.memory_space<vmem>>, vector<8x32xf32>
    %1 = arith.truncf %0 : vector<8x32xf32> to vector<8x32xbf16>
    %c0_1 = arith.constant 0 : index
    %c0_2 = arith.constant 0 : index
    %2 = vector.load %arg2[%c0_1, %c0_2] : memref<32x128xbf16, #tpu.memory_space<vmem>>, vector<32x128xbf16>
    %cst = arith.constant dense<0.000000e+00> : vector<8x128xf32>
    %3 = tpu.matmul %1, %2, %cst {dimension_numbers = #tpu.dot_dimension_numbers<[1], [0], [0], [1], [0, 0, 1, 1], [], []>} : vector<8x32xbf16>, vector<32x128xbf16>, vector<8x128xf32> -> vector<8x128xf32>
    %cst_3 = arith.constant 0.000000e+00 : f32
    %4 = vector.broadcast %cst_3 : f32 to vector<8x128xf32>
    %5 = arith.maximumf %3, %4 : vector<8x128xf32>
    %6 = arith.truncf %5 : vector<8x128xf32> to vector<8x128xbf16>
    %c0_4 = arith.constant 0 : index
    %c0_5 = arith.constant 0 : index
    %7 = vector.load %arg3[%c0_4, %c0_5] : memref<128x32xbf16, #tpu.memory_space<vmem>>, vector<128x32xbf16>
    %cst_6 = arith.constant dense<0.000000e+00> : vector<8x32xf32>
    %8 = tpu.matmul %6, %7, %cst_6 {dimension_numbers = #tpu.dot_dimension_numbers<[1], [0], [0], [1], [0, 0, 1, 1], [], []>} : vector<8x128xbf16>, vector<128x32xbf16>, vector<8x32xf32> -> vector<8x32xf32>
    %cst_7 = arith.constant 0.000000e+00 : f32
    %9 = vector.broadcast %cst_7 : f32 to vector<8x32xf32>
    %10 = arith.maximumf %8, %9 : vector<8x32xf32>
    %cst_8 = arith.constant 2.000000e-01 : f32
    %11 = vector.broadcast %cst_8 : f32 to vector<8x32xf32>
    %12 = arith.mulf %11, %10 : vector<8x32xf32>
    %cst_9 = arith.constant 8.000000e-01 : f32
    %13 = vector.broadcast %cst_9 : f32 to vector<8x32xf32>
    %14 = arith.mulf %13, %0 : vector<8x32xf32>
    %15 = arith.addf %12, %14 : vector<8x32xf32>
    %c0_10 = arith.constant 0 : index
    %c0_11 = arith.constant 0 : index
    %16 = vector.load %arg4[%c0_10, %c0_11] : memref<8x32xf32, #tpu.memory_space<vmem>>, vector<8x32xf32>
    tpu.vector_store %arg4[%c0_10, %c0_11], %15 {strides = array<i32>} : memref<8x32xf32, #tpu.memory_space<vmem>>, vector<8x32xf32>,
    return
  }
  func.func @transform_0(%arg0: i32) -> (i32, i32) {
    %c0_i32 = arith.constant 0 : i32
    %c0_i32_0 = arith.constant 0 : i32
    return %arg0, %c0_i32 : i32, i32
  }
  func.func @transform_1(%arg0: i32) -> (i32, i32) {
    %c0_i32 = arith.constant 0 : i32
    %c0_i32_0 = arith.constant 0 : i32
    %c0_i32_1 = arith.constant 0 : i32
    return %c0_i32, %c0_i32_0 : i32, i32
  }
  func.func @transform_2(%arg0: i32) -> (i32, i32) {
    %c0_i32 = arith.constant 0 : i32
    %c0_i32_0 = arith.constant 0 : i32
    %c0_i32_1 = arith.constant 0 : i32
    return %c0_i32, %c0_i32_0 : i32, i32
  }
  func.func @transform_3(%arg0: i32) -> (i32, i32) {
    %c0_i32 = arith.constant 0 : i32
    %c0_i32_0 = arith.constant 0 : i32
    return %arg0, %c0_i32 : i32, i32
  }
}

</mosaic_0001>

<bundles_post_ra>
// kernel: tpu_custom_call.1
= control target key start
LH: loop header
LB: loop body
LE: loop exit
PB: predicated region body
PF: predicated region fallthrough
CT: control target
= control target key end

     0   :  { %v291_v1 = vmov 0.0   ;;  %vm292_vm0 = vmmov 0   ;;  %vm34_vm1 = vcmask 261120   ;;  %s361_s0 = inlined_call_operand.vmem [shape: f32[8,32], index: 0, kind: input, shape index: {}]   ;;  %s362_s1 = inlined_call_operand.vmem [shape: bf16[32,128], index: 1, kind: input, shape index: {}]   ;;  %s363_s2 = inlined_call_operand.vmem [shape: bf16[128,32], index: 2, kind: input, shape index: {}]   ;;  %s364_s3 = inlined_call_operand.hbm [shape: f32[8,32], index: 3, kind: output, shape index: {}]  }
   0x1   :  { %v257_v0 = vld [vmem:[%s362_s1] sm:$0xff]   ;;  %226 = vmatprep.subr.bf16.mxu0 %v291_v1  ;;  %v258_v2 = vld [vmem:[%s362_s1 + $0x8] sm:$0xff]   ;;  %234 = vmatprep.subr.bf16.mxu1 %v291_v1  ;;  %v261_v7 = vld [vmem:[%s363_s2 + $0x10] sm:$0xff]  }
   0x2   :  { %227 = vmatpush3.bf16.msra.mxu0 %v257_v0  ;;  %230 = vmatprep.mubr.msk.bf16.mxu0 %vm292_vm0, %v291_v1  ;;  %v16_v3 = vld [vmem:[%s361_s0] sm:$0xff]  ;;  %v260_v6 = vld [vmem:[%s363_s2 + $0x8] sm:$0xff]  }
   0x3   :  { %228 = vmatprep.subr.bf16.mxu0 %v291_v1  ;;  %v259_v4 = vld [vmem:[%s363_s2] sm:$0xff]   ;;  %250 = vmatprep.mubr.msk.bf16.mxu1 %vm292_vm0, %v291_v1  ;;  %v17_v5 = vpack.c.bf16 %v16_v3, %v16_v3 }
   0x4   :  { %235 = vmatpush3.bf16.msra.mxu1 %v259_v4 }
   0x5   :  { %236 = vmatprep.subr.bf16.mxu1 %v291_v1 }
   0x6   :  { %229 = vmatpush3.bf16.msra.mxu0 %v258_v2 }
   0x8   :  { %237 = vmatpush3.bf16.msra.mxu1 %v260_v6 }
   0x9   :  { %231 = vmatmul.mubr.msk.bf16.vlgmr.msra.gmra.mrb[0].mxu0 %vm34_vm1, %v17_v5  ;;  %238 = vmatprep.subr.bf16.mxu1 %v291_v1 }
   0xa   :  { %8 = vsyncpa [#allocation3], 0  ;;  %v262_v8 = vld [vmem:[%s363_s2 + $0x18] sm:$0xff]   ;;  %v263_v9 = vld [vmem:[%s363_s2 + $0x20] sm:$0xff]   ;;  %v186_v21 = vmul.f32 0.8, %v16_v3 }
   0xb   :  { %v264_v10 = vld [vmem:[%s363_s2 + $0x28] sm:$0xff]   ;;  %v265_v11 = vld [vmem:[%s363_s2 + $0x30] sm:$0xff]   ;;  %v266_v12 = vld [vmem:[%s363_s2 + $0x38] sm:$0xff]   ;;  %s293_s5 = smov [#allocation2]  }
   0xc   :  { %239 = vmatpush3.bf16.msra.mxu1 %v261_v7  ;;  %s195_s6 = sshll.u32 %s293_s5, 4  ;;  %s196_s6 = int_to_ptr.vmem [resolvable:$true] %s195_s6 }
   0xd   :  { %240 = vmatprep.subr.bf16.mxu1 %v291_v1  ;;  %s267_s2 = scalar_lea.vmem %s196_s6, 128  ;;  %p272_p1 = scmp.lt.s32.totalorder %s196_s6, %s196_s6 }
   0xe   :  { %p268_p0 = scmp.ne.s32.totalorder %s196_s6, %s267_s2  ;;  %p273_p2 = scmp.lt.s32.totalorder %s267_s2, %s267_s2 }
  0x10   :  { %241 = vmatpush3.bf16.msra.mxu1 %v262_v8  ;;  %p274_p3 = por %p273_p2, %p272_p1 }
  0x11   :  { %242 = vmatprep.subr.bf16.mxu1 %v291_v1 }
  0x12   :  { %p275_p4 = pnand %p274_p3, %p268_p0 }
  0x14   :  { %243 = vmatpush3.bf16.msra.mxu1 %v263_v9 }
  0x15   :  { %244 = vmatprep.subr.bf16.mxu1 %v291_v1 }
  0x18   :  { %245 = vmatpush3.bf16.msra.mxu1 %v264_v10 }
  0x19   :  { %246 = vmatprep.subr.bf16.mxu1 %v291_v1 }
  0x1c   :  { %247 = vmatpush3.bf16.msra.mxu1 %v265_v11 }
  0x1d   :  { %248 = vmatprep.subr.bf16.mxu1 %v291_v1 }
  0x20   :  { %249 = vmatpush3.bf16.msra.mxu1 %v266_v12 }
  0xdc   :  { %v72_v13 = vpop.f32.mrb[0].mxu0 }
  0xdd   :  { %v78_v14 = vmax.f32 %v72_v13, 0.0  ;;  %v232_v15 = vpop.f32.mrb[1].mxu0 }
  0xde   :  { %v75_v16 = vpop.f32.mrb[2].mxu0 }
  0xdf   :  { %v79_v17 = vpack.c.bf16 %v78_v14, %v78_v14  ;;  %v233_v18 = vpop.f32.mrb[3].mxu0 }
  0xe1   :  { %251 = vmatmul.mubr.bf16.vlgmr.msra.gmra.mrb[0].mxu1 %v79_v17 }
 0x1b4   :  { %v178_v19 = vpop.f32.mrb[0].mxu1 }
 0x1b5   :  { %v184_v20 = vmax.f32 %v178_v19, 0.0  ;;  %v252_v22 = vpop.f32.mrb[1].mxu1 }
 0x1b6   :  { %v181_v23 = vpop.f32.mrb[2].mxu1 }
 0x1b7   :  { %v185_v24 = vmul.f32 0.2, %v184_v20  ;;  %v253_v25 = vpop.f32.mrb[3].mxu1 }
 0x1b9   :  { %v187_v26 = vadd.f32 %v186_v21, %v185_v24 }
 0x1bb   :  { %188 = vst.msk [vmem:[#allocation2] sm:$0xff] %vm34_vm1, %v187_v26 }
 0x1bc   :  { %278 = shalt.err (!%p275_p4)
}
 0x1bd   :  { %s279_s9 = scalar_lea.hbm %s364_s3, 128 }
 0x1be   :  { %p280_p5 = scmp.ne.s32.totalorder %s364_s3, %s279_s9  ;;  %p283_p6 = scmp.lt.u32.totalorder %s279_s9, %s364_s3 }
 0x1c0   :  { %p285_p7 = pnand %p283_p6, %p280_p5 }
 0x1c2   :  { %288 = shalt.err (!%p285_p7)
}
 0x1c3   :  { %198 = dma.vmem_to_hbm [thread:$0]  %s196_s6, 128, %s364_s3, [#allocation3]  }
 0x1c4   :  { %289 = dma.done.wait [#allocation3], 128  }
 0x1c5   :  { %290 = vsyncadd [#allocation3], 4294967168 }
 0x1c6   :  { %202 = vsyncpa [#allocation3], 1 }

</bundles_post_ra>
